<compile_context>
chip_gen: v7x
topology: tpu7x:2x2x1
jax: 0.10.0
libtpu: 0.0.40
codegen_flags: <defaults>
</compile_context>

<pallas_src>
import functools

import jax
import jax.numpy as jnp
import numpy as np
from jax import lax
from jax.experimental import pallas as pl
from jax.experimental.pallas import tpu as pltpu


_VMEM = functools.partial(pl.BlockSpec, memory_space=pltpu.MemorySpace.VMEM)


def _ceil_to(v, m):
    return ((v + m - 1) // m) * m


# ----------------------------------------------------------------------------
# Fused DenseGCNModel (all DenseGCNConv layers in a single kernel)
# ----------------------------------------------------------------------------

def make_dense_gcn_kernel(num_layers):
    def kernel(*refs):
        x_ref, adj_ref, dis_ref = refs[0], refs[1], refs[2]
        wb_refs = refs[3:3 + 2 * num_layers]
        emb_refs = refs[3 + 2 * num_layers:]

        adj = adj_ref[...]          # bf16 (N, N), cast done wrapper-side
        dis = dis_ref[...]          # f32  (N, 1), deg^-1/2 computed from f32 adj
        h = x_ref[...]              # f32  (N, K0p)

        for l in range(num_layers):
            w = wb_refs[2 * l][...]          # bf16 (pre-cast, zero-padded)
            b = wb_refs[2 * l + 1][...]      # f32  (1, Fp)
            # DenseGCNConv (add_loop=False): D^-1/2 A D^-1/2 (H W) + b, then ReLU.
            hw = jnp.dot(h.astype(jnp.bfloat16), w,
                         preferred_element_type=jnp.float32)            # (N, Fp) f32 acc
            agg = jnp.dot(adj, (dis * hw).astype(jnp.bfloat16),
                          preferred_element_type=jnp.float32)
            h = jnp.maximum(dis * agg + b, 0.0)
            emb_refs[l][...] = h                                         # lane-dense store
        # TODO(synk): nn.Dropout(0.1) / dropout_adj are training-only; eval semantics here.
    return kernel


def dense_gcn_forward(x, adj, gcn_params):
    """DenseGCNModel forward: returns the per-layer embeddings list."""
    n = x.shape[0]
    num_layers = len(gcn_params)

    # D^-1/2 from the f32 adj (degree sum kept f32); adj streamed bf16 to the kernel.
    deg = jnp.maximum(jnp.sum(adj, axis=-1, keepdims=True), 1.0)
    dis = lax.rsqrt(deg)                                                 # (N, 1) f32
    adj_bf = adj.astype(jnp.bfloat16)

    # Zero-pad feature dims to multiples of 128 (lane-dense, MXU granule); exact-equivalent.
    in_dim = x.shape[1]
    in_dim_p = _ceil_to(in_dim, 128)
    x_p = jnp.pad(x, ((0, 0), (0, in_dim_p - in_dim)))

    flat, out_shapes, true_out = [], [], []
    prev_p = in_dim_p
    for (w, b) in gcn_params:
        fin, fout = w.shape
        fout_p = _ceil_to(fout, 128)
        w_p = jnp.zeros((prev_p, fout_p), jnp.bfloat16).at[:fin, :fout].set(
            w.astype(jnp.bfloat16))
        b_p = jnp.zeros((1, fout_p), jnp.float32).at[:, :fout].set(b)
        flat += [w_p, b_p]
        out_shapes.append(jax.ShapeDtypeStruct((n, fout_p), jnp.float32))
        true_out.append(fout)
        prev_p = fout_p

    # Explicit VMEM budget (gridless call, single-buffered residents), clamped so it is a
    # legal scoped limit on v5e (128 MiB phys), v6e (128 MiB) and v7x (64 MiB).
    nbytes = lambda a: int(a.size) * a.dtype.itemsize
    resident = (nbytes(x_p) + nbytes(adj_bf) + nbytes(dis)
                + sum(nbytes(a) for a in flat)
                + sum(int(np.prod(s.shape)) * 4 for s in out_shapes))
    vmem_limit = int(min(64 << 20, max(32 << 20, 2 * resident + (2 << 20))))

    embs_p = pl.pallas_call(
        make_dense_gcn_kernel(num_layers),
        out_shape=tuple(out_shapes),
        in_specs=[_VMEM()] * (3 + 2 * num_layers),
        out_specs=tuple(_VMEM() for _ in range(num_layers)),
        compiler_params=pltpu.CompilerParams(vmem_limit_bytes=vmem_limit),
    )(x_p, adj_bf, dis, *flat)

    # Slice padded feature dims back to true widths (last layer is already 128-aligned, so
    # it feeds the contrast call with no intervening XLA copy).
    embs = [e if e.shape[1] == f else e[:, :f] for e, f in zip(embs_p, true_out)]
    return embs


# ----------------------------------------------------------------------------
# Fused Contrast heads: grid=(4,) over heads, "parallel" axis
# ----------------------------------------------------------------------------

def contrast_heads_kernel(aff_ref, zb_ref, pos_ref,
                          w1_ref, b1_ref, w2_ref, b2_ref,
                          loss_ref, emb_ref, *, tau, lam):
    za = aff_ref[...]                                # (n, H) f32, drug/target block of GCN out
    zb = zb_ref[0]                                   # (n, H) f32
    pos = pos_ref[0]                                 # (n, n) f32
    w1 = w1_ref[0]                                   # (H, H) bf16 (pre-cast)
    b1 = b1_ref[0]                                   # (1, H) f32
    w2 = w2_ref[0]                                   # (H, E) bf16 (pre-cast)
    b2 = b2_ref[0]                                   # (1, E) f32
    e = w2.shape[-1]

    def proj(z):                                     # shared projection MLP (fc1-ELU-fc2)
        h = jnp.dot(z.astype(jnp.bfloat16), w1,
                    preferred_element_type=jnp.float32) + b1
        h = jnp.where(h > 0.0, h, jnp.exp(jnp.minimum(h, 0.0)) - 1.0)   # ELU in f32
        return jnp.dot(h.astype(jnp.bfloat16), w2,
                       preferred_element_type=jnp.float32) + b2

    za_p = proj(za)                                  # (n, E) f32
    zb_p = proj(zb)                                  # (n, E) f32

    # Cosine similarity: eps-guarded rsqrt row-normalization, 1/tau folded into the a-side
    # before the matmul; dot_general contracts dim 1 of both operands (no transpose).
    qa = za_p * (lax.rsqrt(jnp.sum(za_p * za_p, axis=-1, keepdims=True) + 1e-12)
                 * (1.0 / tau))
    qb = zb_p * lax.rsqrt(jnp.sum(zb_p * zb_p, axis=-1, keepdims=True) + 1e-12)
    logits = lax.dot_general(qa, qb, (((1,), (1,)), ((), ())),
                             preferred_element_type=jnp.float32)         # (n, n)
    sim = jnp.exp(logits)

    # Bidirectional NCE losses without materializing a2b/b2a or sim.T; the b->a numerator
    # uses an in-kernel XLU transpose of pos (no second pos input).
    pos_t = pos.T
    row_den = jnp.sum(sim, axis=1, keepdims=True) + 1e-8                 # (n, 1)
    row_num = jnp.sum(sim * pos, axis=1, keepdims=True) + 1e-12
    col_den = jnp.sum(sim, axis=0, keepdims=True) + 1e-8                 # (1, n)
    col_num = jnp.sum(sim * pos_t, axis=0, keepdims=True) + 1e-12

    lori_a = -jnp.mean(jnp.log(row_num) - jnp.log(row_den), axis=0, keepdims=True)  # (1,1)
    lori_b = -jnp.mean(jnp.log(col_num) - jnp.log(col_den), axis=1, keepdims=True)  # (1,1)
    loss = lam * lori_a + (1.0 - lam) * lori_b

    loss_ref[0] = jnp.broadcast_to(loss, (1, 128))                       # lane-dense scalar
    # concat(za_proj, zb_proj) via two lane-aligned slice-stores (no in-kernel concat copy).
    emb_ref[0, :, 0:e] = za_p
    emb_ref[0, :, e:2 * e] = zb_p


def contrast_heads(affinity_emb, zb_stack, pos_stack, head_params, num_d, tau, lam):
    num_heads, n, hidden = zb_stack.shape
    e = head_params["w2"].shape[-1]

    # Pre-cast projection weights to bf16 in the wrapper (biases stay f32).
    w1_bf = head_params["w1"].astype(jnp.bfloat16)
    w2_bf = head_params["w2"].astype(jnp.bfloat16)

    kern = functools.partial(contrast_heads_kernel, tau=tau, lam=lam)

    def head_spec(shape):
        return pl.BlockSpec((1,) + shape, lambda h: (h, 0, 0))

    losses, embs = pl.pallas_call(
        kern,
        grid=(num_heads,),
        out_shape=(
            jax.ShapeDtypeStruct((num_heads, 1, 128), jnp.float32),
            jax.ShapeDtypeStruct((num_heads, n, 2 * e), jnp.float32),
        ),
        in_specs=[
            # Affinity GCN embedding consumed directly: head h -> drug (h%2==0) / target
            # (h%2==1) row block.  Avoids the wrapper slice+stack HBM round trip.
            pl.BlockSpec((num_d, hidden), lambda h: (h % 2, 0)),
            head_spec((n, hidden)),          # zb
            head_spec((n, n)),               # pos
            head_spec((hidden, hidden)),     # w1 (bf16)
            head_spec((1, hidden)),          # b1
            head_spec((hidden, e)),          # w2 (bf16)
            head_spec((1, e)),               # b2
        ],
        out_specs=(
            head_spec((1, 128)),             # per-head loss (lane-dense slab)
            head_spec((n, 2 * e)),           # per-head concat(za_proj, zb_proj)
        ),
        compiler_params=pltpu.CompilerParams(dimension_semantics=("parallel",)),
    )(affinity_emb, zb_stack, pos_stack,
      w1_bf, head_params["b1"], w2_bf, head_params["b2"])
    return losses[:, 0, 0], embs


# ----------------------------------------------------------------------------
# Parameter init (deterministic, synthetic)
# ----------------------------------------------------------------------------

def xavier_normal(key, shape, gain=1.0):
    fan_in, fan_out = shape
    std = gain * np.sqrt(2.0 / (fan_in + fan_out))
    return std * jax.random.normal(key, shape, jnp.float32)


def init_contrast_params(key, hidden_dim, output_dim):
    k1, k2, k3, k4 = jax.random.split(key, 4)
    bound = 1.0 / np.sqrt(hidden_dim)
    return {
        "w1": xavier_normal(k1, (hidden_dim, hidden_dim), gain=1.414),
        "b1": jax.random.uniform(k2, (1, hidden_dim), jnp.float32, -bound, bound),
        "w2": xavier_normal(k3, (hidden_dim, output_dim), gain=1.414),
        "b2": jax.random.uniform(k4, (1, output_dim), jnp.float32, -bound, bound),
    }


def init_gcn_params(key, layers_dim):
    params = []
    keys = jax.random.split(key, len(layers_dim) - 1)
    for i in range(len(layers_dim) - 1):
        w = xavier_normal(keys[i], (layers_dim[i], layers_dim[i + 1]))
        b = jnp.zeros((1, layers_dim[i + 1]), jnp.float32)
        params.append((w, b))
    return params


def stack_head_params(head_params_list):
    return {k: jnp.stack([p[k] for p in head_params_list])
            for k in ("w1", "b1", "w2", "b2")}


# ----------------------------------------------------------------------------
# TCCLDTA forward (glue in JAX, hot paths in 2 fused Pallas calls)
# ----------------------------------------------------------------------------

def tccldta_forward(params, affinity_x, adj,
                    drug_seq_emb, target_seq_emb,
                    drug_graph_emb, target_graph_emb,
                    drug_pos, target_pos, *, num_d, tau, lam):
    # affinity_graph_conv: DenseGCNModel (returns all per-layer embeddings; last is used)
    gcn_embeddings = dense_gcn_forward(affinity_x, adj, params["gcn"])
    affinity_graph_embedding = gcn_embeddings[-1]                      # (N, 256)

    # TODO(synk): Sequence_drug / Sequence_protein / Graph_drug / Graph_protein encoders
    # are undefined in the reference source; their 256-d embeddings are passed in.

    # 4 Contrast heads fused into one grid=(4,) "parallel" pallas_call.  The affinity
    # embedding is consumed directly by the kernel (per-head drug/target block via
    # index_map) -- no wrapper-side slicing/stacking of it.
    # TODO(synk): head stacking assumes num_drug == num_target; unequal sizes need pad+mask.
    zb_stack = jnp.stack([drug_graph_emb, target_graph_emb, drug_seq_emb, target_seq_emb])
    pos_stack = jnp.stack([drug_pos, target_pos, drug_pos, target_pos])
    head_params = stack_head_params([params["drug_graph_contrast"],
                                     params["target_graph_contrast"],
                                     params["drug_seq_contrast"],
                                     params["target_seq_contrast"]])

    losses, embs = contrast_heads(affinity_graph_embedding, zb_stack, pos_stack,
                                  head_params, num_d, tau, lam)

    loss = jnp.sum(losses)
    a = embs[0] + embs[2]                    # drug: graph-contrast + seq-contrast embeddings
    b = embs[1] + embs[3]                    # target: graph-contrast + seq-contrast embeddings
    return loss, a, b, gcn_embeddings


# ----------------------------------------------------------------------------
# Main
# ----------------------------------------------------------------------------

if __name__ == "__main__":
    key = jax.random.PRNGKey(0)
    keys = jax.random.split(key, 16)

    # Small shapes consistent with the module's forward.
    num_d, num_t = 8, 8
    N = num_d + num_t
    in_dim = 32
    ns_dims = [in_dim, 64, 256]              # last GCN dim = 256 (Contrast hidden_dim)
    embedding_dim = 128
    tau, lam = 0.5, 0.5

    params = {
        "gcn": init_gcn_params(keys[0], ns_dims),
        "drug_graph_contrast": init_contrast_params(keys[1], 256, embedding_dim),
        "target_graph_contrast": init_contrast_params(keys[2], 256, embedding_dim),
        "drug_seq_contrast": init_contrast_params(keys[3], 256, embedding_dim),
        "target_seq_contrast": init_contrast_params(keys[4], 256, embedding_dim),
    }

    affinity_x = jax.random.normal(keys[5], (N, in_dim), jnp.float32)
    u = jnp.abs(jax.random.normal(keys[6], (N, N), jnp.float32))
    mask = (jax.random.uniform(keys[7], (N, N)) > 0.5).astype(jnp.float32)
    adj = (u * mask + (u * mask).T) * 0.5                              # symmetric, non-neg

    drug_graph_emb = jax.random.normal(keys[8], (num_d, 256), jnp.float32)
    target_graph_emb = jax.random.normal(keys[9], (num_t, 256), jnp.float32)
    drug_seq_emb = jax.random.normal(keys[10], (num_d, 256), jnp.float32)
    target_seq_emb = jax.random.normal(keys[11], (num_t, 256), jnp.float32)

    drug_pos = jnp.eye(num_d, dtype=jnp.float32)
    target_pos = jnp.eye(num_t, dtype=jnp.float32)

    forward = jax.jit(tccldta_forward, static_argnames=("num_d", "tau", "lam"))
    loss, a, b, gcn_embs = forward(
        params, affinity_x, adj,
        drug_seq_emb, target_seq_emb,
        drug_graph_emb, target_graph_emb,
        drug_pos, target_pos, num_d=num_d, tau=tau, lam=lam)

    jax.block_until_ready((loss, a, b, gcn_embs))
    assert a.shape == (num_d, 2 * embedding_dim)
    assert b.shape == (num_t, 2 * embedding_dim)
    assert gcn_embs[0].shape == (N, ns_dims[1])
    assert gcn_embs[1].shape == (N, ns_dims[2])
    assert bool(jnp.isfinite(loss))
    assert bool(jnp.all(jnp.isfinite(a))) and bool(jnp.all(jnp.isfinite(b)))
    print("KERNEL_OK")
</pallas_src>

<mosaic_0001>
module attributes {stable_mosaic.version = 11 : i64} {
  func.func @kernel(%arg0: memref<16x128xf32, #tpu.memory_space<vmem>>, %arg1: memref<16x16xbf16, #tpu.memory_space<vmem>>, %arg2: memref<16x1xf32, #tpu.memory_space<vmem>>, %arg3: memref<128x128xbf16, #tpu.memory_space<vmem>>, %arg4: memref<1x128xf32, #tpu.memory_space<vmem>>, %arg5: memref<128x256xbf16, #tpu.memory_space<vmem>>, %arg6: memref<1x256xf32, #tpu.memory_space<vmem>>, %arg7: memref<16x128xf32, #tpu.memory_space<vmem>>, %arg8: memref<16x256xf32, #tpu.memory_space<vmem>>) attributes {dimension_semantics = [], scalar_prefetch = 0 : i64, scratch_operands = 0 : i64, tpu.core_type = #tpu.core_type<tc>} {
    %c0 = arith.constant 0 : index
    %c0_0 = arith.constant 0 : index
    %0 = vector.load %arg1[%c0, %c0_0] : memref<16x16xbf16, #tpu.memory_space<vmem>>, vector<16x16xbf16>
    %c0_1 = arith.constant 0 : index
    %c0_2 = arith.constant 0 : index
    %1 = vector.load %arg2[%c0_1, %c0_2] : memref<16x1xf32, #tpu.memory_space<vmem>>, vector<16x1xf32>
    %c0_3 = arith.constant 0 : index
    %c0_4 = arith.constant 0 : index
    %2 = vector.load %arg0[%c0_3, %c0_4] : memref<16x128xf32, #tpu.memory_space<vmem>>, vector<16x128xf32>
    %c0_5 = arith.constant 0 : index
    %c0_6 = arith.constant 0 : index
    %3 = vector.load %arg3[%c0_5, %c0_6] : memref<128x128xbf16, #tpu.memory_space<vmem>>, vector<128x128xbf16>
    %c0_7 = arith.constant 0 : index
    %c0_8 = arith.constant 0 : index
    %4 = vector.load %arg4[%c0_7, %c0_8] : memref<1x128xf32, #tpu.memory_space<vmem>>, vector<1x128xf32>
    %5 = arith.truncf %2 : vector<16x128xf32> to vector<16x128xbf16>
    %cst = arith.constant dense<0.000000e+00> : vector<16x128xf32>
    %6 = tpu.matmul %5, %3, %cst {dimension_numbers = #tpu.dot_dimension_numbers<[1], [0], [0], [1], [0, 0, 1, 1], [], []>} : vector<16x128xbf16>, vector<128x128xbf16>, vector<16x128xf32> -> vector<16x128xf32>
    %7 = vector.broadcast %1 : vector<16x1xf32> to vector<16x128xf32>
    %8 = arith.mulf %7, %6 : vector<16x128xf32>
    %9 = arith.truncf %8 : vector<16x128xf32> to vector<16x128xbf16>
    %cst_9 = arith.constant dense<0.000000e+00> : vector<16x128xf32>
    %10 = tpu.matmul %0, %9, %cst_9 {dimension_numbers = #tpu.dot_dimension_numbers<[1], [0], [0], [1], [0, 0, 1, 1], [], []>} : vector<16x16xbf16>, vector<16x128xbf16>, vector<16x128xf32> -> vector<16x128xf32>
    %11 = vector.broadcast %1 : vector<16x1xf32> to vector<16x128xf32>
    %12 = arith.mulf %11, %10 : vector<16x128xf32>
    %13 = vector.broadcast %4 : vector<1x128xf32> to vector<16x128xf32>
    %14 = arith.addf %12, %13 : vector<16x128xf32>
    %cst_10 = arith.constant 0.000000e+00 : f32
    %15 = vector.broadcast %cst_10 : f32 to vector<16x128xf32>
    %16 = arith.maximumf %14, %15 : vector<16x128xf32>
    %c0_11 = arith.constant 0 : index
    %c0_12 = arith.constant 0 : index
    %17 = vector.load %arg7[%c0_11, %c0_12] : memref<16x128xf32, #tpu.memory_space<vmem>>, vector<16x128xf32>
    tpu.vector_store %arg7[%c0_11, %c0_12], %16 {strides = array<i32>} : memref<16x128xf32, #tpu.memory_space<vmem>>, vector<16x128xf32>,
    %c0_13 = arith.constant 0 : index
    %c0_14 = arith.constant 0 : index
    %18 = vector.load %arg5[%c0_13, %c0_14] : memref<128x256xbf16, #tpu.memory_space<vmem>>, vector<128x256xbf16>
    %c0_15 = arith.constant 0 : index
    %c0_16 = arith.constant 0 : index
    %19 = vector.load %arg6[%c0_15, %c0_16] : memref<1x256xf32, #tpu.memory_space<vmem>>, vector<1x256xf32>
    %20 = arith.truncf %16 : vector<16x128xf32> to vector<16x128xbf16>
    %cst_17 = arith.constant dense<0.000000e+00> : vector<16x256xf32>
    %21 = tpu.matmul %20, %18, %cst_17 {dimension_numbers = #tpu.dot_dimension_numbers<[1], [0], [0], [1], [0, 0, 1, 1], [], []>} : vector<16x128xbf16>, vector<128x256xbf16>, vector<16x256xf32> -> vector<16x256xf32>
    %22 = vector.broadcast %1 : vector<16x1xf32> to vector<16x256xf32>
    %23 = arith.mulf %22, %21 : vector<16x256xf32>
    %24 = arith.truncf %23 : vector<16x256xf32> to vector<16x256xbf16>
    %cst_18 = arith.constant dense<0.000000e+00> : vector<16x256xf32>
    %25 = tpu.matmul %0, %24, %cst_18 {dimension_numbers = #tpu.dot_dimension_numbers<[1], [0], [0], [1], [0, 0, 1, 1], [], []>} : vector<16x16xbf16>, vector<16x256xbf16>, vector<16x256xf32> -> vector<16x256xf32>
    %26 = vector.broadcast %1 : vector<16x1xf32> to vector<16x256xf32>
    %27 = arith.mulf %26, %25 : vector<16x256xf32>
    %28 = vector.broadcast %19 : vector<1x256xf32> to vector<16x256xf32>
    %29 = arith.addf %27, %28 : vector<16x256xf32>
    %cst_19 = arith.constant 0.000000e+00 : f32
    %30 = vector.broadcast %cst_19 : f32 to vector<16x256xf32>
    %31 = arith.maximumf %29, %30 : vector<16x256xf32>
    %c0_20 = arith.constant 0 : index
    %c0_21 = arith.constant 0 : index
    %32 = vector.load %arg8[%c0_20, %c0_21] : memref<16x256xf32, #tpu.memory_space<vmem>>, vector<16x256xf32>
    tpu.vector_store %arg8[%c0_20, %c0_21], %31 {strides = array<i32>} : memref<16x256xf32, #tpu.memory_space<vmem>>, vector<16x256xf32>,
    return
  }
}

module attributes {stable_mosaic.version = 11 : i64} {
  func.func @contrast_heads_kernel(%arg0: i32, %arg1: memref<8x256xf32, #tpu.memory_space<vmem>>, %arg2: memref<1x8x256xf32, #tpu.memory_space<vmem>>, %arg3: memref<1x8x8xf32, #tpu.memory_space<vmem>>, %arg4: memref<1x256x256xbf16, #tpu.memory_space<vmem>>, %arg5: memref<1x1x256xf32, #tpu.memory_space<vmem>>, %arg6: memref<1x256x128xbf16, #tpu.memory_space<vmem>>, %arg7: memref<1x1x128xf32, #tpu.memory_space<vmem>>, %arg8: memref<1x1x128xf32, #tpu.memory_space<vmem>>, %arg9: memref<1x8x256xf32, #tpu.memory_space<vmem>>) attributes {dimension_semantics = [#tpu.dimension_semantics<parallel>], iteration_bounds = array<i64: 4>, scalar_prefetch = 0 : i64, scratch_operands = 0 : i64, tpu.core_type = #tpu.core_type<tc>, window_params = [{transform_indices = @transform_0, window_bounds = array<i64: 8, 256>}, {transform_indices = @transform_1, window_bounds = array<i64: 1, 8, 256>}, {transform_indices = @transform_2, window_bounds = array<i64: 1, 8, 8>}, {transform_indices = @transform_3, window_bounds = array<i64: 1, 256, 256>}, {transform_indices = @transform_4, window_bounds = array<i64: 1, 1, 256>}, {transform_indices = @transform_5, window_bounds = array<i64: 1, 256, 128>}, {transform_indices = @transform_6, window_bounds = array<i64: 1, 1, 128>}, {transform_indices = @transform_7, window_bounds = array<i64: 1, 1, 128>}, {transform_indices = @transform_8, window_bounds = array<i64: 1, 8, 256>}]} {
    %c0 = arith.constant 0 : index
    %c0_0 = arith.constant 0 : index
    %0 = vector.load %arg1[%c0, %c0_0] : memref<8x256xf32, #tpu.memory_space<vmem>>, vector<8x256xf32>
    %c0_1 = arith.constant 0 : index
    %c0_2 = arith.constant 0 : index
    %c0_3 = arith.constant 0 : index
    %1 = vector.load %arg2[%c0_1, %c0_2, %c0_3] : memref<1x8x256xf32, #tpu.memory_space<vmem>>, vector<1x8x256xf32>
    %2 = vector.shape_cast %1 : vector<1x8x256xf32> to vector<8x256xf32>
    %c0_4 = arith.constant 0 : index
    %c0_5 = arith.constant 0 : index
    %c0_6 = arith.constant 0 : index
    %3 = vector.load %arg3[%c0_4, %c0_5, %c0_6] : memref<1x8x8xf32, #tpu.memory_space<vmem>>, vector<1x8x8xf32>
    %4 = vector.shape_cast %3 : vector<1x8x8xf32> to vector<8x8xf32>
    %c0_7 = arith.constant 0 : index
    %c0_8 = arith.constant 0 : index
    %c0_9 = arith.constant 0 : index
    %5 = vector.load %arg4[%c0_7, %c0_8, %c0_9] : memref<1x256x256xbf16, #tpu.memory_space<vmem>>, vector<1x256x256xbf16>
    %6 = vector.shape_cast %5 : vector<1x256x256xbf16> to vector<256x256xbf16>
    %c0_10 = arith.constant 0 : index
    %c0_11 = arith.constant 0 : index
    %c0_12 = arith.constant 0 : index
    %7 = vector.load %arg5[%c0_10, %c0_11, %c0_12] : memref<1x1x256xf32, #tpu.memory_space<vmem>>, vector<1x1x256xf32>
    %8 = vector.shape_cast %7 : vector<1x1x256xf32> to vector<1x256xf32>
    %c0_13 = arith.constant 0 : index
    %c0_14 = arith.constant 0 : index
    %c0_15 = arith.constant 0 : index
    %9 = vector.load %arg6[%c0_13, %c0_14, %c0_15] : memref<1x256x128xbf16, #tpu.memory_space<vmem>>, vector<1x256x128xbf16>
    %10 = vector.shape_cast %9 : vector<1x256x128xbf16> to vector<256x128xbf16>
    %c0_16 = arith.constant 0 : index
    %c0_17 = arith.constant 0 : index
    %c0_18 = arith.constant 0 : index
    %11 = vector.load %arg7[%c0_16, %c0_17, %c0_18] : memref<1x1x128xf32, #tpu.memory_space<vmem>>, vector<1x1x128xf32>
    %12 = vector.shape_cast %11 : vector<1x1x128xf32> to vector<1x128xf32>
    %13 = arith.truncf %0 : vector<8x256xf32> to vector<8x256xbf16>
    %cst = arith.constant dense<0.000000e+00> : vector<8x256xf32>
    %14 = tpu.matmul %13, %6, %cst {dimension_numbers = #tpu.dot_dimension_numbers<[1], [0], [0], [1], [0, 0, 1, 1], [], []>} : vector<8x256xbf16>, vector<256x256xbf16>, vector<8x256xf32> -> vector<8x256xf32>
    %15 = vector.broadcast %8 : vector<1x256xf32> to vector<8x256xf32>
    %16 = arith.addf %14, %15 : vector<8x256xf32>
    %cst_19 = arith.constant 0.000000e+00 : f32
    %17 = vector.broadcast %cst_19 : f32 to vector<8x256xf32>
    %18 = arith.cmpf ogt, %16, %17 : vector<8x256xf32>
    %cst_20 = arith.constant 0.000000e+00 : f32
    %19 = vector.broadcast %cst_20 : f32 to vector<8x256xf32>
    %20 = arith.minimumf %16, %19 : vector<8x256xf32>
    %21 = math.exp %20 : vector<8x256xf32>
    %cst_21 = arith.constant 1.000000e+00 : f32
    %22 = vector.broadcast %cst_21 : f32 to vector<8x256xf32>
    %23 = arith.subf %21, %22 : vector<8x256xf32>
    %24 = arith.select %18, %16, %23 : vector<8x256xi1>, vector<8x256xf32>
    %25 = arith.truncf %24 : vector<8x256xf32> to vector<8x256xbf16>
    %cst_22 = arith.constant dense<0.000000e+00> : vector<8x128xf32>
    %26 = tpu.matmul %25, %10, %cst_22 {dimension_numbers = #tpu.dot_dimension_numbers<[1], [0], [0], [1], [0, 0, 1, 1], [], []>} : vector<8x256xbf16>, vector<256x128xbf16>, vector<8x128xf32> -> vector<8x128xf32>
    %27 = vector.broadcast %12 : vector<1x128xf32> to vector<8x128xf32>
    %28 = arith.addf %26, %27 : vector<8x128xf32>
    %29 = arith.truncf %2 : vector<8x256xf32> to vector<8x256xbf16>
    %cst_23 = arith.constant dense<0.000000e+00> : vector<8x256xf32>
    %30 = tpu.matmul %29, %6, %cst_23 {dimension_numbers = #tpu.dot_dimension_numbers<[1], [0], [0], [1], [0, 0, 1, 1], [], []>} : vector<8x256xbf16>, vector<256x256xbf16>, vector<8x256xf32> -> vector<8x256xf32>
    %31 = vector.broadcast %8 : vector<1x256xf32> to vector<8x256xf32>
    %32 = arith.addf %30, %31 : vector<8x256xf32>
    %cst_24 = arith.constant 0.000000e+00 : f32
    %33 = vector.broadcast %cst_24 : f32 to vector<8x256xf32>
    %34 = arith.cmpf ogt, %32, %33 : vector<8x256xf32>
    %cst_25 = arith.constant 0.000000e+00 : f32
    %35 = vector.broadcast %cst_25 : f32 to vector<8x256xf32>
    %36 = arith.minimumf %32, %35 : vector<8x256xf32>
    %37 = math.exp %36 : vector<8x256xf32>
    %cst_26 = arith.constant 1.000000e+00 : f32
    %38 = vector.broadcast %cst_26 : f32 to vector<8x256xf32>
    %39 = arith.subf %37, %38 : vector<8x256xf32>
    %40 = arith.select %34, %32, %39 : vector<8x256xi1>, vector<8x256xf32>
    %41 = arith.truncf %40 : vector<8x256xf32> to vector<8x256xbf16>
    %cst_27 = arith.constant dense<0.000000e+00> : vector<8x128xf32>
    %42 = tpu.matmul %41, %10, %cst_27 {dimension_numbers = #tpu.dot_dimension_numbers<[1], [0], [0], [1], [0, 0, 1, 1], [], []>} : vector<8x256xbf16>, vector<256x128xbf16>, vector<8x128xf32> -> vector<8x128xf32>
    %43 = vector.broadcast %12 : vector<1x128xf32> to vector<8x128xf32>
    %44 = arith.addf %42, %43 : vector<8x128xf32>
    %45 = arith.mulf %28, %28 : vector<8x128xf32>
    %cst_28 = arith.constant dense<0.000000e+00> : vector<8xf32>
    %46 = vector.multi_reduction <add>, %45, %cst_28 [1] : vector<8x128xf32> to vector<8xf32>
    %47 = vector.shape_cast %46 : vector<8xf32> to vector<8x1xf32>
    %cst_29 = arith.constant 9.99999996E-13 : f32
    %48 = vector.broadcast %cst_29 : f32 to vector<8x1xf32>
    %49 = arith.addf %47, %48 : vector<8x1xf32>
    %50 = math.rsqrt %49 : vector<8x1xf32>
    %cst_30 = arith.constant 2.000000e+00 : f32
    %51 = vector.broadcast %cst_30 : f32 to vector<8x1xf32>
    %52 = arith.mulf %50, %51 : vector<8x1xf32>
    %53 = vector.broadcast %52 : vector<8x1xf32> to vector<8x128xf32>
    %54 = arith.mulf %28, %53 : vector<8x128xf32>
    %55 = arith.mulf %44, %44 : vector<8x128xf32>
    %cst_31 = arith.constant dense<0.000000e+00> : vector<8xf32>
    %56 = vector.multi_reduction <add>, %55, %cst_31 [1] : vector<8x128xf32> to vector<8xf32>
    %57 = vector.shape_cast %56 : vector<8xf32> to vector<8x1xf32>
    %cst_32 = arith.constant 9.99999996E-13 : f32
    %58 = vector.broadcast %cst_32 : f32 to vector<8x1xf32>
    %59 = arith.addf %57, %58 : vector<8x1xf32>
    %60 = math.rsqrt %59 : vector<8x1xf32>
    %61 = vector.broadcast %60 : vector<8x1xf32> to vector<8x128xf32>
    %62 = arith.mulf %44, %61 : vector<8x128xf32>
    %cst_33 = arith.constant dense<0.000000e+00> : vector<8x8xf32>
    %63 = tpu.matmul %54, %62, %cst_33 {dimension_numbers = #tpu.dot_dimension_numbers<[1], [1], [0], [0], [0, 0, 1, 0], [], []>} : vector<8x128xf32>, vector<8x128xf32>, vector<8x8xf32> -> vector<8x8xf32>
    %64 = math.exp %63 : vector<8x8xf32>
    %65 = tpu.transpose %4, [1, 0] : vector<8x8xf32> -> vector<8x8xf32>
    %cst_34 = arith.constant dense<0.000000e+00> : vector<8xf32>
    %66 = vector.multi_reduction <add>, %64, %cst_34 [1] : vector<8x8xf32> to vector<8xf32>
    %67 = vector.shape_cast %66 : vector<8xf32> to vector<8x1xf32>
    %cst_35 = arith.constant 9.99999993E-9 : f32
    %68 = vector.broadcast %cst_35 : f32 to vector<8x1xf32>
    %69 = arith.addf %67, %68 : vector<8x1xf32>
    %70 = arith.mulf %64, %4 : vector<8x8xf32>
    %cst_36 = arith.constant dense<0.000000e+00> : vector<8xf32>
    %71 = vector.multi_reduction <add>, %70, %cst_36 [1] : vector<8x8xf32> to vector<8xf32>
    %72 = vector.shape_cast %71 : vector<8xf32> to vector<8x1xf32>
    %cst_37 = arith.constant 9.99999996E-13 : f32
    %73 = vector.broadcast %cst_37 : f32 to vector<8x1xf32>
    %74 = arith.addf %72, %73 : vector<8x1xf32>
    %cst_38 = arith.constant dense<0.000000e+00> : vector<8xf32>
    %75 = vector.multi_reduction <add>, %64, %cst_38 [0] : vector<8x8xf32> to vector<8xf32>
    %76 = vector.shape_cast %75 : vector<8xf32> to vector<1x8xf32>
    %cst_39 = arith.constant 9.99999993E-9 : f32
    %77 = vector.broadcast %cst_39 : f32 to vector<1x8xf32>
    %78 = arith.addf %76, %77 : vector<1x8xf32>
    %79 = arith.mulf %64, %65 : vector<8x8xf32>
    %cst_40 = arith.constant dense<0.000000e+00> : vector<8xf32>
    %80 = vector.multi_reduction <add>, %79, %cst_40 [0] : vector<8x8xf32> to vector<8xf32>
    %81 = vector.shape_cast %80 : vector<8xf32> to vector<1x8xf32>
    %cst_41 = arith.constant 9.99999996E-13 : f32
    %82 = vector.broadcast %cst_41 : f32 to vector<1x8xf32>
    %83 = arith.addf %81, %82 : vector<1x8xf32>
    %84 = math.log %74 : vector<8x1xf32>
    %85 = math.log %69 : vector<8x1xf32>
    %86 = arith.subf %84, %85 : vector<8x1xf32>
    %cst_42 = arith.constant dense<0.000000e+00> : vector<1xf32>
    %87 = vector.multi_reduction <add>, %86, %cst_42 [0] : vector<8x1xf32> to vector<1xf32>
    %88 = vector.shape_cast %87 : vector<1xf32> to vector<1x1xf32>
    %cst_43 = arith.constant 8.000000e+00 : f32
    %89 = vector.broadcast %cst_43 : f32 to vector<1x1xf32>
    %90 = arith.divf %88, %89 : vector<1x1xf32>
    %cst_44 = arith.constant 0.000000e+00 : f32
    %91 = vector.broadcast %cst_44 : f32 to vector<1x1xf32>
    %92 = arith.subf %91, %90 : vector<1x1xf32>
    %93 = math.log %83 : vector<1x8xf32>
    %94 = math.log %78 : vector<1x8xf32>
    %95 = arith.subf %93, %94 : vector<1x8xf32>
    %cst_45 = arith.constant dense<0.000000e+00> : vector<1xf32>
    %96 = vector.multi_reduction <add>, %95, %cst_45 [1] : vector<1x8xf32> to vector<1xf32>
    %97 = vector.shape_cast %96 : vector<1xf32> to vector<1x1xf32>
    %cst_46 = arith.constant 8.000000e+00 : f32
    %98 = vector.broadcast %cst_46 : f32 to vector<1x1xf32>
    %99 = arith.divf %97, %98 : vector<1x1xf32>
    %cst_47 = arith.constant 0.000000e+00 : f32
    %100 = vector.broadcast %cst_47 : f32 to vector<1x1xf32>
    %101 = arith.subf %100, %99 : vector<1x1xf32>
    %cst_48 = arith.constant 5.000000e-01 : f32
    %102 = vector.broadcast %cst_48 : f32 to vector<1x1xf32>
    %103 = arith.mulf %102, %92 : vector<1x1xf32>
    %cst_49 = arith.constant 5.000000e-01 : f32
    %104 = vector.broadcast %cst_49 : f32 to vector<1x1xf32>
    %105 = arith.mulf %104, %101 : vector<1x1xf32>
    %106 = arith.addf %103, %105 : vector<1x1xf32>
    %107 = vector.shape_cast %106 : vector<1x1xf32> to vector<1x1xf32>
    %108 = vector.broadcast %107 : vector<1x1xf32> to vector<1x128xf32>
    %c0_50 = arith.constant 0 : index
    %c0_51 = arith.constant 0 : index
    %c0_52 = arith.constant 0 : index
    %109 = vector.load %arg8[%c0_50, %c0_51, %c0_52] : memref<1x1x128xf32, #tpu.memory_space<vmem>>, vector<1x1x128xf32>
    %110 = vector.shape_cast %109 : vector<1x1x128xf32> to vector<1x128xf32>
    %111 = vector.shape_cast %108 : vector<1x128xf32> to vector<1x1x128xf32>
    tpu.vector_store %arg8[%c0_50, %c0_51, %c0_52], %111 {strides = array<i32>} : memref<1x1x128xf32, #tpu.memory_space<vmem>>, vector<1x1x128xf32>,
    %c0_53 = arith.constant 0 : index
    %c0_54 = arith.constant 0 : index
    %c0_55 = arith.constant 0 : index
    %112 = vector.load %arg9[%c0_53, %c0_54, %c0_55] : memref<1x8x256xf32, #tpu.memory_space<vmem>>, vector<1x8x128xf32>
    %113 = vector.shape_cast %112 : vector<1x8x128xf32> to vector<8x128xf32>
    %114 = vector.shape_cast %28 : vector<8x128xf32> to vector<1x8x128xf32>
    tpu.vector_store %arg9[%c0_53, %c0_54, %c0_55], %114 {strides = array<i32>} : memref<1x8x256xf32, #tpu.memory_space<vmem>>, vector<1x8x128xf32>,
    %c0_56 = arith.constant 0 : index
    %c0_57 = arith.constant 0 : index
    %c128 = arith.constant 128 : index
    %115 = vector.load %arg9[%c0_56, %c0_57, %c128] : memref<1x8x256xf32, #tpu.memory_space<vmem>>, vector<1x8x128xf32>
    %116 = vector.shape_cast %115 : vector<1x8x128xf32> to vector<8x128xf32>
    %117 = vector.shape_cast %44 : vector<8x128xf32> to vector<1x8x128xf32>
    tpu.vector_store %arg9[%c0_56, %c0_57, %c128], %117 {strides = array<i32>} : memref<1x8x256xf32, #tpu.memory_space<vmem>>, vector<1x8x128xf32>,
    return
  }
  func.func @transform_0(%arg0: i32) -> (i32, i32) {
    %c2_i32 = arith.constant 2 : i32
    %c0_i32 = arith.constant 0 : i32
    %0 = arith.cmpi eq, %c2_i32, %c0_i32 : i32
    %c1_i32 = arith.constant 1 : i32
    %1 = arith.select %0, %c1_i32, %c2_i32 : i32
    %2 = arith.remsi %arg0, %1 : i32
    %c0_i32_0 = arith.constant 0 : i32
    %3 = arith.cmpi ne, %2, %c0_i32_0 : i32
    %c0_i32_1 = arith.constant 0 : i32
    %4 = arith.cmpi slt, %2, %c0_i32_1 : i32
    %c0_i32_2 = arith.constant 0 : i32
    %5 = arith.cmpi slt, %1, %c0_i32_2 : i32
    %6 = arith.xori %4, %5 : i1
    %7 = arith.andi %6, %3 : i1
    %8 = arith.addi %2, %1 : i32
    %9 = arith.select %7, %8, %2 : i32
    %c0_i32_3 = arith.constant 0 : i32
    %c0_i32_4 = arith.constant 0 : i32
    return %9, %c0_i32_3 : i32, i32
  }
  func.func @transform_1(%arg0: i32) -> (i32, i32, i32) {
    %c0_i32 = arith.constant 0 : i32
    %c0_i32_0 = arith.constant 0 : i32
    %c0_i32_1 = arith.constant 0 : i32
    return %arg0, %c0_i32, %c0_i32_0 : i32, i32, i32
  }
  func.func @transform_2(%arg0: i32) -> (i32, i32, i32) {
    %c0_i32 = arith.constant 0 : i32
    %c0_i32_0 = arith.constant 0 : i32
    %c0_i32_1 = arith.constant 0 : i32
    return %arg0, %c0_i32, %c0_i32_0 : i32, i32, i32
  }
  func.func @transform_3(%arg0: i32) -> (i32, i32, i32) {
    %c0_i32 = arith.constant 0 : i32
    %c0_i32_0 = arith.constant 0 : i32
    %c0_i32_1 = arith.constant 0 : i32
    return %arg0, %c0_i32, %c0_i32_0 : i32, i32, i32
  }
  func.func @transform_4(%arg0: i32) -> (i32, i32, i32) {
    %c0_i32 = arith.constant 0 : i32
    %c0_i32_0 = arith.constant 0 : i32
    %c0_i32_1 = arith.constant 0 : i32
    return %arg0, %c0_i32, %c0_i32_0 : i32, i32, i32
  }
  func.func @transform_5(%arg0: i32) -> (i32, i32, i32) {
    %c0_i32 = arith.constant 0 : i32
    %c0_i32_0 = arith.constant 0 : i32
    %c0_i32_1 = arith.constant 0 : i32
    return %arg0, %c0_i32, %c0_i32_0 : i32, i32, i32
  }
  func.func @transform_6(%arg0: i32) -> (i32, i32, i32) {
    %c0_i32 = arith.constant 0 : i32
    %c0_i32_0 = arith.constant 0 : i32
    %c0_i32_1 = arith.constant 0 : i32
    return %arg0, %c0_i32, %c0_i32_0 : i32, i32, i32
  }
  func.func @transform_7(%arg0: i32) -> (i32, i32, i32) {
    %c0_i32 = arith.constant 0 : i32
    %c0_i32_0 = arith.constant 0 : i32
    %c0_i32_1 = arith.constant 0 : i32
    return %arg0, %c0_i32, %c0_i32_0 : i32, i32, i32
  }
  func.func @transform_8(%arg0: i32) -> (i32, i32, i32) {
    %c0_i32 = arith.constant 0 : i32
    %c0_i32_0 = arith.constant 0 : i32
    %c0_i32_1 = arith.constant 0 : i32
    return %arg0, %c0_i32, %c0_i32_0 : i32, i32, i32
  }
}

</mosaic_0001>

<bundles_post_ra>
// kernel: tccldta_forward.2
= control target key start
LH: loop header
LB: loop body
LE: loop exit
PB: predicated region body
PF: predicated region fallthrough
CT: control target
= control target key end

     0   :  { %v586_v1 = vmov 0.0   ;;  %vm587_vm0 = vmmov 0   ;;  %v588_v3 = vmov 0   ;;  %s776_s0 = inlined_call_operand.vmem [shape: f32[16,128], index: 0, kind: input, shape index: {}]   ;;  %s777_s1 = inlined_call_operand.vmem [shape: bf16[16,16], index: 1, kind: input, shape index: {}]   ;;  %s778_s2 = inlined_call_operand.vmem [shape: f32[16,1], index: 2, kind: input, shape index: {}]   ;;  %s779_s3 = inlined_call_operand.vmem [shape: bf16[128,128], index: 3, kind: input, shape index: {}]   ;;  %s780_s4 = inlined_call_operand.vmem [shape: f32[1,128], index: 4, kind: input, shape index: {}]   ;;  %s781_s5 = inlined_call_operand.vmem [shape: bf16[128,256], index: 5, kind: input, shape index: {}]   ;;  %s782_s6 = inlined_call_operand.vmem [shape: f32[1,256], index: 6, kind: input, shape index: {}]   ;;  %s783_s7 = inlined_call_operand.hbm [shape: f32[16,128], index: 7, kind: output, shape index: {0}]   ;;  %s784_s8 = inlined_call_operand.vmem [shape: f32[16,256], index: 8, kind: output, shape index: {1}]  }
   0x1   :  { %v529_v0 = vld [vmem:[%s779_s3] sm:$0xff]   ;;  %496 = vmatprep.subr.bf16.mxu0 %v586_v1  ;;  %516 = vmatprep.subr.bf16.mxu1 %v586_v1  ;;  %v530_v2 = vld [vmem:[%s779_s3 + $0x8] sm:$0xff]   ;;  %v531_v4 = vld [vmem:[%s779_s3 + $0x10] sm:$0xff]  }
   0x2   :  { %497 = vmatpush3.bf16.msra.mxu0 %v529_v0  ;;  %512 = vmatprep.mubr.msk.bf16.mxu0 %vm587_vm0, %v586_v1  ;;  %v532_v5 = vld [vmem:[%s779_s3 + $0x18] sm:$0xff]   ;;  %v32_v6 = vld [vmem:[%s778_s2] sm:$0xff]  ;;  %v33_v7 = vld [vmem:[%s778_s2 + $0x8] sm:$0xff] }
   0x3   :  { %498 = vmatprep.subr.bf16.mxu0 %v586_v1  ;;  %528 = vset.pattern.permute.xlu0 %v588_v3  ;;  %v533_v8 = vld [vmem:[%s779_s3 + $0x20] sm:$0xff]  }
   0x4   :  { %518 = vmatprep.mubr.msk.bf16.mxu1 %vm587_vm0, %v586_v1  ;;  %145 = vperm.xlu0 %528, %v32_v6  }
   0x6   :  { %499 = vmatpush3.bf16.msra.mxu0 %v530_v2 }
   0x7   :  { %500 = vmatprep.subr.bf16.mxu0 %v586_v1 }
   0x8   :  { %150 = vperm.xlu0 %528, %v33_v7  }
   0xa   :  { %501 = vmatpush3.bf16.msra.mxu0 %v531_v4 }
   0xb   :  { %502 = vmatprep.subr.bf16.mxu0 %v586_v1 }
   0xe   :  { %503 = vmatpush3.bf16.msra.mxu0 %v532_v5 }
   0xf   :  { %504 = vmatprep.subr.bf16.mxu0 %v586_v1 }
  0x10   :  { %14 = vsyncpa [#allocation3], 0  ;;  %v534_v9 = vld [vmem:[%s779_s3 + $0x28] sm:$0xff]   ;;  %v535_v10 = vld [vmem:[%s779_s3 + $0x30] sm:$0xff]   ;;  %vm161_vm1 = vcmask 130048  }
  0x11   :  { %v536_v11 = vld [vmem:[%s779_s3 + $0x38] sm:$0xff]   ;;  %v34_v12 = vld [vmem:[%s776_s0] sm:$0xff]  ;;  %v35_v13 = vld [vmem:[%s776_s0 + $0x8] sm:$0xff] }
  0x12   :  { %505 = vmatpush3.bf16.msra.mxu0 %v533_v8  ;;  %v53_v14 = vpack.c.bf16 %v35_v13, %v34_v12  ;;  %v540_v23 = vld [vmem:[%s781_s5 + $0x4] ss:$8 sps:$4 sm:$0xff]   ;;  %v538_v26 = vld [vmem:[%s781_s5] ss:$8 sps:$4 sm:$0xff]   ;;  %v543_v27 = vld [vmem:[%s781_s5 + $0x14] ss:$8 sps:$4 sm:$0xff]  }
  0x13   :  { %506 = vmatprep.subr.bf16.mxu0 %v586_v1  ;;  %v685_v25 = vld [vmem:[%s777_s1] sm:$0xff]   ;;  %v541_v28 = vld [vmem:[%s781_s5 + $0x10] ss:$8 sps:$4 sm:$0xff]   ;;  %v549_v31 = vld [vmem:[%s781_s5 + $0x34] ss:$8 sps:$4 sm:$0xff]  }
  0x14   :  { %v546_v29 = vld [vmem:[%s781_s5 + $0x24] ss:$8 sps:$4 sm:$0xff]   ;;  %v544_v30 = vld [vmem:[%s781_s5 + $0x20] ss:$8 sps:$4 sm:$0xff]   ;;  %v547_v32 = vld [vmem:[%s781_s5 + $0x30] ss:$8 sps:$4 sm:$0xff]  }
  0x15   :  { %v552_v33 = vld [vmem:[%s781_s5 + $0x44] ss:$8 sps:$4 sm:$0xff]   ;;  %v550_v34 = vld [vmem:[%s781_s5 + $0x40] ss:$8 sps:$4 sm:$0xff]   ;;  %v555_v35 = vld [vmem:[%s781_s5 + $0x54] ss:$8 sps:$4 sm:$0xff]  }
  0x16   :  { %507 = vmatpush3.bf16.msra.mxu0 %v534_v9  ;;  %v553_v36 = vld [vmem:[%s781_s5 + $0x50] ss:$8 sps:$4 sm:$0xff]   ;;  %v558_v37 = vld [vmem:[%s781_s5 + $0x64] ss:$8 sps:$4 sm:$0xff]   ;;  %v556_v38 = vld [vmem:[%s781_s5 + $0x60] ss:$8 sps:$4 sm:$0xff]  }
  0x17   :  { %508 = vmatprep.subr.bf16.mxu0 %v586_v1  ;;  %v561_v39 = vld [vmem:[%s781_s5 + $0x74] ss:$8 sps:$4 sm:$0xff]   ;;  %v559_v40 = vld [vmem:[%s781_s5 + $0x70] ss:$8 sps:$4 sm:$0xff]   ;;  %v467_v41 = vld [vmem:[%s780_s4] ss:$0 sm:$0xff] }
  0x18   :  { %s589_s4 = smov [#allocation2]  }
  0x19   :  { %s442_s5 = sshll.u32 %s589_s4, 4  ;;  %s443_s5 = int_to_ptr.vmem [resolvable:$true] %s442_s5 }
  0x1a   :  { %509 = vmatpush3.bf16.msra.mxu0 %v535_v10  ;;  %s562_s1 = scalar_lea.vmem %s443_s5, 256  ;;  %p567_p1 = scmp.lt.s32.totalorder %s443_s5, %s443_s5 }
  0x1b   :  { %510 = vmatprep.subr.bf16.mxu0 %v586_v1  ;;  %p563_p0 = scmp.ne.s32.totalorder %s443_s5, %s562_s1  ;;  %p568_p2 = scmp.lt.s32.totalorder %s562_s1, %s562_s1 }
  0x1d   :  { %p569_p3 = por %p568_p2, %p567_p1 }
  0x1e   :  { %511 = vmatpush3.bf16.msra.mxu0 %v536_v11 }
  0x1f   :  { %p570_p4 = pnand %p569_p3, %p563_p0 }
  0x21   :  { %513 = vmatmul.mubr.bf16.vlgmr.msra.gmra.mrb[0].mxu0 %v53_v14 }
  0x22   :  { %399 = vmatprep.mubr.bf16.mxu0 %v588_v3 }
  0x83   :  { %v673_v15 = vpop.permute.xlu0 %145 }
  0x87   :  { %v675_v18 = vpop.permute.xlu0 %150 }
  0xf4   :  { %v136_v16 = vpop.f32.mrb[0].mxu0 }
  0xf5   :  { %v514_v17 = vpop.f32.mrb[1].mxu0  ;;  %v153_v20 = vmul.f32 %v673_v15, %v136_v16 }
  0xf6   :  { %v139_v19 = vpop.f32.mrb[2].mxu0 }
  0xf7   :  { %v154_v21 = vmul.f32 %v675_v18, %v139_v19  ;;  %v515_v22 = vpop.f32.mrb[3].mxu0 }
  0xf9   :  { %v155_v24 = vpack.c.bf16 %v154_v21, %v153_v20 }
  0xfb   :  { %517 = vmatpush3.bf16.msra.mxu1 %v155_v24 }
  0xfc   :  { %318 = vmatprep.subr.bf16.mxu1 %v540_v23 }
  0xfe   :  { %519 = vmatmul.mubr.msk.bf16.vlgmr.msra.gmra.mrb[0].mxu1 %vm161_vm1, %v685_v25 }
  0xff   :  { %319 = vmatpush1.bf16.msra.mxu1 %v538_v26  ;;  %350 = vmatprep.mubr.bf16.mxu1 %v588_v3 }
 0x100   :  { %320 = vmatprep.subr.bf16.mxu1 %v543_v27 }
 0x103   :  { %321 = vmatpush1.bf16.msra.mxu1 %v541_v28 }
 0x104   :  { %322 = vmatprep.subr.bf16.mxu1 %v546_v29 }
 0x107   :  { %323 = vmatpush1.bf16.msra.mxu1 %v544_v30 }
 0x108   :  { %324 = vmatprep.subr.bf16.mxu1 %v549_v31 }
 0x10b   :  { %325 = vmatpush1.bf16.msra.mxu1 %v547_v32 }
 0x10c   :  { %326 = vmatprep.subr.bf16.mxu1 %v552_v33 }
 0x10f   :  { %327 = vmatpush1.bf16.msra.mxu1 %v550_v34 }
 0x110   :  { %328 = vmatprep.subr.bf16.mxu1 %v555_v35 }
 0x113   :  { %329 = vmatpush1.bf16.msra.mxu1 %v553_v36 }
 0x114   :  { %330 = vmatprep.subr.bf16.mxu1 %v558_v37 }
 0x117   :  { %331 = vmatpush1.bf16.msra.mxu1 %v556_v38 }
 0x118   :  { %332 = vmatprep.subr.bf16.mxu1 %v561_v39 }
 0x11b   :  { %333 = vmatpush1.bf16.msra.mxu1 %v559_v40 }
 0x1d1   :  { %v199_v42 = vpop.f32.mrb[0].mxu1 }
 0x1d2   :  { %v206_v43 = vmul.f32 %v199_v42, %v673_v15  ;;  %v520_v44 = vpop.f32.mrb[1].mxu1 }
 0x1d3   :  { %v202_v45 = vpop.f32.mrb[2].mxu1 }
 0x1d4   :  { %v214_v46 = vadd.f32 %v467_v41, %v206_v43  ;;  %v207_v47 = vmul.f32 %v202_v45, %v675_v18  ;;  %v521_v48 = vpop.f32.mrb[3].mxu1 }
 0x1d6   :  { %v216_v49 = vmax.f32 %v214_v46, 0.0  ;;  %v215_v50 = vadd.f32 %v467_v41, %v207_v47 }
 0x1d8   :  { %218 = vst [vmem:[#allocation2] sm:$0xff] %v216_v49  ;;  %v217_v51 = vmax.f32 %v215_v50, 0.0 }
 0x1da   :  { %219 = vst [vmem:[#allocation2 + $0x8] sm:$0xff] %v217_v51  ;;  %v237_v52 = vpack.c.bf16 %v217_v51, %v216_v49 }
 0x1dc   :  { %351 = vmatmul.mubr.bf16.vlgmr.msra.gmra.mrb[4].mxu1 %v237_v52 }
 0x2af   :  { %v352_v53 = vpop.f32.mrb[4].mxu1 }
 0x2b0   :  { %v354_v54 = vpop.f32.mrb[5].mxu1  ;;  %v361_v56 = vmul.f32 %v352_v53, %v673_v15 }
 0x2b1   :  { %v356_v55 = vpop.f32.mrb[6].mxu1  ;;  %v362_v59 = vmul.f32 %v354_v54, %v673_v15 }
 0x2b2   :  { %v363_v57 = vmul.f32 %v356_v55, %v675_v18  ;;  %v358_v58 = vpop.f32.mrb[7].mxu1 }
 0x2b3   :  { %v364_v60 = vmul.f32 %v358_v58, %v675_v18 }
 0x2b4   :  { %v365_v61 = vpack.c.bf16 %v363_v57, %v361_v56 }
 0x2b5   :  { %v366_v62 = vpack.c.bf16 %v364_v60, %v362_v59 }
 0x2b7   :  { %367 = vmatprep.subr.bf16.mxu0 %v366_v62 }
 0x2b8   :  { %368 = vmatpush1.bf16.msra.mxu0 %v365_v61 }
 0x2bb   :  { %484 = vmatmul.mubr.msk.bf16.vlgmr.msra.gmra.mrb[4].mxu0 %vm161_vm1, %v685_v25 }
 0x2bc   :  { %573 = shalt.err (!%p570_p4)
}
 0x2bd   :  { %s574_s16 = scalar_lea.hbm %s783_s7, 256 }
 0x2be   :  { %p575_p5 = scmp.ne.s32.totalorder %s783_s7, %s574_s16  ;;  %p578_p6 = scmp.lt.u32.totalorder %s574_s16, %s783_s7 }
 0x2c0   :  { %p580_p7 = pnand %p578_p6, %p575_p5 }
 0x2c2   :  { %583 = shalt.err (!%p580_p7)
}
 0x2c3   :  { %s590_s21 = smov 128   ;;  %s591_s22 = smov 8   ;;  %v415_v63 = vlaneseq  ;;  %v236_v2 = vld [vmem:[%s782_s6] sm:$0x3] }
 0x2c4   :  { %448 = dma.vmem_to_hbm [thread:$0]  %s443_s5, 256, %s783_s7, [#allocation3], %s590_s21, %s590_s21, %s591_s22  }
 0x2c5   :  { %v416_v0 = vshrl.u32 %v415_v63, 7 }
 0x2c7   :  { %v417_v1 = vsub.s32 0, %v416_v0  ;;  %v421_v3 = vsub.s32 1, %v416_v0 }
 0x2c9   :  { %v418_v4 = vrot.slane %v236_v2, %v417_v1  ;;  %v422_v6 = vrot.slane %v236_v2, %v421_v3 }
 0x38e   :  { %v401_v5 = vpop.f32.mrb[4].mxu0 }
 0x38f   :  { %v410_v7 = vmul.f32 %v401_v5, %v673_v15  ;;  %v403_v8 = vpop.f32.mrb[5].mxu0 }
 0x390   :  { %v411_v9 = vmul.f32 %v403_v8, %v673_v15  ;;  %v405_v10 = vpop.f32.mrb[6].mxu0 }
 0x391   :  { %v425_v11 = vadd.f32 %v418_v4, %v410_v7  ;;  %v412_v12 = vmul.f32 %v405_v10, %v675_v18  ;;  %v407_v13 = vpop.f32.mrb[7].mxu0 }
 0x392   :  { %v426_v14 = vadd.f32 %v422_v6, %v411_v9  ;;  %v413_v16 = vmul.f32 %v407_v13, %v675_v18 }
 0x393   :  { %v429_v17 = vmax.f32 %v425_v11, 0.0  ;;  %v427_v19 = vadd.f32 %v418_v4, %v412_v12 }
 0x394   :  { %v430_v20 = vmax.f32 %v426_v14, 0.0  ;;  %v428_v21 = vadd.f32 %v422_v6, %v413_v16 }
 0x395   :  { %433 = vst [vmem:[%s784_s8] sm:$0xff] %v429_v17  ;;  %v431_v22 = vmax.f32 %v427_v19, 0.0 }
 0x396   :  { %434 = vst [vmem:[%s784_s8 + $0x8] sm:$0xff] %v430_v20  ;;  %v432_v15 = vmax.f32 %v428_v21, 0.0 }
 0x397   :  { %435 = vst [vmem:[%s784_s8 + $0x10] sm:$0xff] %v431_v22 }
 0x398   :  { %436 = vst [vmem:[%s784_s8 + $0x18] sm:$0xff] %v432_v15 }
 0x399   :  { %584 = dma.done.wait [#allocation3], 256  }
 0x39a   :  { %585 = vsyncadd [#allocation3], 4294967040 }
 0x39b   :  { %456 = vsyncpa [#allocation3], 1 }

// kernel: tccldta_forward.3
= control target key start
LH: loop header
LB: loop body
LE: loop exit
PB: predicated region body
PF: predicated region fallthrough
CT: control target
= control target key end

     0   :  { %s1656_s27 = smov 0   ;;  %s1911_s0 = inlined_call_operand.vmem [shape: f32[16,256], index: 0, kind: input, shape index: {}]   ;;  %s1912_s1 = inlined_call_operand.vmem [shape: f32[4,8,256], index: 1, kind: input, shape index: {}]   ;;  %s1913_s2 = inlined_call_operand.vmem [shape: f32[4,8,8], index: 2, kind: input, shape index: {}]   ;;  %s1914_s3 = inlined_call_operand.vmem [shape: bf16[4,256,256], index: 3, kind: input, shape index: {}]   ;;  %s1915_s4 = inlined_call_operand.vmem [shape: f32[4,1,256], index: 4, kind: input, shape index: {}]   ;;  %s1916_s5 = inlined_call_operand.vmem [shape: bf16[4,256,128], index: 5, kind: input, shape index: {}]   ;;  %s1917_s6 = inlined_call_operand.vmem [shape: f32[4,1,128], index: 6, kind: input, shape index: {}]   ;;  %s1918_s7 = inlined_call_operand.vmem [shape: f32[4,1,128], index: 7, kind: output, shape index: {0}]   ;;  %s1919_s8 = inlined_call_operand.vmem [shape: f32[4,8,256], index: 8, kind: output, shape index: {1}]  }
   0x1 LB: > { %s1368_s28 = sadd.s32 4294967295, %s1607_s27   ;;  %p1378_p0 = scmp.ge.s32.totalorder %s1607_s27, 1  ;;  %s1607_s27 = sphi %s1656_s27, %s19_s27  }
   0x2   : > { %p369_p1 = scmp.lt.s32.totalorder %s1607_s27, 5 }
   0x4   : > { %p370_p2 = pnand %p1378_p0, %p369_p1 }
   0x5   : > { %p473_p3 = scmp.lt.s32.totalorder (!%p370_p2), %s1368_s28, 3  ;;  %p444_p4 = scmp.lt.s32.totalorder (!%p370_p2), %s1368_s28, 0  ;;  %v582_v52 = vlaneseq (!%p370_p2)  ;;  %vm1610_vm4 = vmmov (!%p370_p2), 0   ;;  %vm1163_vm5 = vcmask (!%p370_p2), 64512  }
   0x6   : > { %373 = sbr.rel (%p370_p2) target bundleno = 1409 (0x581), region = 48  ;;  %s445_s29 = ssub.s32 (!%p370_p2), 0, %s1368_s28 }
   0x7   : > { %s1379_s9 = smin.u32 (!%p370_p2), %s1368_s28, %s445_s29  ;;  %v583_v53 = vshrl.u32 (!%p370_p2), %v582_v52, 7 }
   0x8   : > { %s447_s11 = sand.u32 (!%p370_p2), 1, %s1379_s9  }
   0x9   : > { %s448_s15 = ssub.s32 (!%p370_p2), 0, %s447_s11  ;;  %v584_v54 = vsub.s32 (!%p370_p2), 0, %v583_v53  ;;  %v588_v56 = vsub.s32 (!%p370_p2), 1, %v583_v53 }
   0xd   : > { %s1664_s30 = scalar_select %p473_p3, %s1368_s28, 3 }
   0xe   : > { %s1921_s15 = smov (!%p444_p4, %s448_s15), %s447_s11 }
   0xf   : > { %s1451_s10 = sshll.u32 %s1664_s30, 8  ;;  %p1381_p5 = scmp.lt.s32.totalorder %s1921_s15, 0 }
  0x10   : > { %s1670_s14 = scalar_lea.vmem %s1914_s3, %s1451_s10  ;;  %s454_s16 = sadd.s32 2, %s1921_s15 }
  0x11   : > { %v1673_v0 = vld [vmem:[%s1670_s14 + $0x4] ss:$8 sps:$4 sm:$0xff]   ;;  %v1676_v1 = vld [vmem:[%s1670_s14] ss:$8 sps:$4 sm:$0xff]   ;;  %v1680_v2 = vld [vmem:[%s1670_s14 + $0x14] ss:$8 sps:$4 sm:$0xff]   ;;  %s1923_s16 = smov (!%p1381_p5, %s454_s16), %s1921_s15  ;;  %s498_s15 = scalar_lea.vmem %s1917_s6, %s1664_s30 }
  0x12   : > { %752 = vmatprep.subr.bf16.mxu0 %v1673_v0  ;;  %v1684_v3 = vld [vmem:[%s1670_s14 + $0x10] ss:$8 sps:$4 sm:$0xff]   ;;  %v1688_v4 = vld [vmem:[%s1670_s14 + $0x24] ss:$8 sps:$4 sm:$0xff]   ;;  %v1692_v5 = vld [vmem:[%s1670_s14 + $0x20] ss:$8 sps:$4 sm:$0xff]  }
  0x13   : > { %753 = vmatpush1.bf16.msra.mxu0 %v1676_v1  ;;  %p456_p6 = scmp.lt.s32.totalorder %s1923_s16, 1  ;;  %v1696_v6 = vld [vmem:[%s1670_s14 + $0x34] ss:$8 sps:$4 sm:$0xff]   ;;  %v1700_v7 = vld [vmem:[%s1670_s14 + $0x30] ss:$8 sps:$4 sm:$0xff]   ;;  %s1452_s18 = sshll.u32 %s1664_s30, 7 }
  0x14   : > { %754 = vmatprep.subr.bf16.mxu0 %v1680_v2  ;;  %v1704_v8 = vld [vmem:[%s1670_s14 + $0x44] ss:$8 sps:$4 sm:$0xff]   ;;  %v1708_v9 = vld [vmem:[%s1670_s14 + $0x40] ss:$8 sps:$4 sm:$0xff]   ;;  %v1712_v10 = vld [vmem:[%s1670_s14 + $0x54] ss:$8 sps:$4 sm:$0xff]   ;;  %s1727_s24 = scalar_lea.vmem %s1916_s5, %s1452_s18 }
  0x15   : > { %s1925_s16 = smov (!%p456_p6, %s1923_s16), 1  ;;  %v1722_v11 = vld [vmem:[%s1670_s14 + $0x50] ss:$8 sps:$4 sm:$0xff]   ;;  %v1731_v12 = vld [vmem:[%s1670_s14 + $0x64] ss:$8 sps:$4 sm:$0xff]   ;;  %s1389_s25 = sshll.u32 %s1664_s30, 1 }
  0x16   : > { %s1449_s17 = sshll.u32 %s1925_s16, 4  ;;  %v1734_v13 = vld [vmem:[%s1670_s14 + $0x60] ss:$8 sps:$4 sm:$0xff]   ;;  %v1738_v15 = vld [vmem:[%s1670_s14 + $0x74] ss:$8 sps:$4 sm:$0xff]   ;;  %s490_s29 = scalar_lea.vmem %s1915_s4, %s1389_s25 }
  0x17   : > { %755 = vmatpush1.bf16.msra.mxu0 %v1684_v3  ;;  %s1718_s21 = scalar_lea.vmem %s1911_s0, %s1449_s17  ;;  %v1563_v17 = vld [vmem:[%s1727_s24 + $0x40] sm:$0xff]   ;;  %v1565_v19 = vld [vmem:[%s1727_s24 + $0x48] sm:$0xff]   ;;  %v1746_v20 = vld [vmem:[%s1670_s14 + $0x70] ss:$8 sps:$4 sm:$0xff]   ;;  %s1450_s9 = sshll.u32 %s1664_s30, 4 }
  0x18   : > { %756 = vmatprep.subr.bf16.mxu0 %v1688_v4  ;;  %v509_v14 = vld [vmem:[%s1718_s21 + $0x8] sm:$0xff]  ;;  %v1564_v18 = vld [vmem:[%s1727_s24] sm:$0xff]   ;;  %1454 = vmatprep.subr.bf16.mxu1 %v1563_v17  ;;  %v1758_v24 = vld [vmem:[%s1670_s14 + $0x94] ss:$8 sps:$4 sm:$0xff]   ;;  %s1846_s12 = scalar_lea.vmem %s1912_s1, %s1450_s9  ;;  %s1890_s18 = scalar_lea.vmem %s1919_s8, %s1450_s9 }
  0x19   : > { %v580_v16 = vpack.c.bf16 %v509_v14, %v509_v14  ;;  %v1749_v21 = vld [vmem:[%s1670_s14 + $0x84] ss:$8 sps:$4 sm:$0xff]   ;;  %1455 = vmatpush3.bf16.msra.mxu1 %v1564_v18  ;;  %v1755_v23 = vld [vmem:[%s1670_s14 + $0x80] ss:$8 sps:$4 sm:$0xff]   ;;  %v1764_v25 = vld [vmem:[%s1670_s14 + $0x90] ss:$8 sps:$4 sm:$0xff]   ;;  %s501_s25 = scalar_lea.vmem %s1918_s7, %s1664_s30 }
  0x1a   : > { %v1566_v22 = vld [vmem:[%s1727_s24 + $0x8] sm:$0xff]   ;;  %1456 = vmatprep.subr.bf16.mxu1 %v1565_v19  ;;  %v1776_v28 = vld [vmem:[%s1670_s14 + $0xb4] ss:$8 sps:$4 sm:$0xff]   ;;  %v1780_v29 = vld [vmem:[%s1670_s14 + $0xb0] ss:$8 sps:$4 sm:$0xff]   ;;  %s1386_s19 = sshll.u32 %s1664_s30, 3 }
  0x1b   : > { %757 = vmatpush1.bf16.msra.mxu0 %v1692_v5  ;;  %784 = vmatprep.mubr.bf16.mxu0 %v580_v16  ;;  %v1768_v26 = vld [vmem:[%s1670_s14 + $0xa4] ss:$8 sps:$4 sm:$0xff]   ;;  %v1772_v27 = vld [vmem:[%s1670_s14 + $0xa0] ss:$8 sps:$4 sm:$0xff]   ;;  %v1792_v32 = vld [vmem:[%s1670_s14 + $0xd4] ss:$8 sps:$4 sm:$0xff]   ;;  %s481_s22 = scalar_lea.vmem %s1913_s2, %s1386_s19 }
  0x1c   : > { %758 = vmatprep.subr.bf16.mxu0 %v1696_v6  ;;  %v1784_v30 = vld [vmem:[%s1670_s14 + $0xc4] ss:$8 sps:$4 sm:$0xff]   ;;  %v1788_v31 = vld [vmem:[%s1670_s14 + $0xc0] ss:$8 sps:$4 sm:$0xff]   ;;  %v1796_v33 = vld [vmem:[%s1670_s14 + $0xd0] ss:$8 sps:$4 sm:$0xff]  }
  0x1d   : > { %1457 = vmatpush3.bf16.msra.mxu1 %v1566_v22  ;;  %v1800_v34 = vld [vmem:[%s1670_s14 + $0xe4] ss:$8 sps:$4 sm:$0xff]   ;;  %v1804_v35 = vld [vmem:[%s1670_s14 + $0xe0] ss:$8 sps:$4 sm:$0xff]   ;;  %v1808_v36 = vld [vmem:[%s1670_s14 + $0xf4] ss:$8 sps:$4 sm:$0xff]  }
  0x1e   : > { %v1812_v37 = vld [vmem:[%s1670_s14 + $0xf0] ss:$8 sps:$4 sm:$0xff]   ;;  %v508_v38 = vld [vmem:[%s1718_s21] sm:$0xff]  ;;  %v1573_v46 = vld [vmem:[%s1727_s24 + $0x68] sm:$0xff]  }
  0x1f   : > { %759 = vmatpush1.bf16.msra.mxu0 %v1700_v7  ;;  %v579_v39 = vpack.c.bf16 %v508_v38, %v508_v38  ;;  %v1567_v40 = vld [vmem:[%s1727_s24 + $0x50] sm:$0xff]   ;;  %v1569_v42 = vld [vmem:[%s1727_s24 + $0x58] sm:$0xff]   ;;  %v1571_v44 = vld [vmem:[%s1727_s24 + $0x60] sm:$0xff]  }
  0x20   : > { %760 = vmatprep.subr.bf16.mxu0 %v1704_v8  ;;  %v1568_v41 = vld [vmem:[%s1727_s24 + $0x10] sm:$0xff]   ;;  %1458 = vmatprep.subr.bf16.mxu1 %v1567_v40  ;;  %v1570_v43 = vld [vmem:[%s1727_s24 + $0x18] sm:$0xff]   ;;  %v1572_v45 = vld [vmem:[%s1727_s24 + $0x20] sm:$0xff]  }
  0x21   : > { %1459 = vmatpush3.bf16.msra.mxu1 %v1568_v41  ;;  %v1574_v47 = vld [vmem:[%s1727_s24 + $0x28] sm:$0xff]   ;;  %v1575_v48 = vld [vmem:[%s1727_s24 + $0x70] sm:$0xff]   ;;  %v1577_v50 = vld [vmem:[%s1727_s24 + $0x78] sm:$0xff]  }
  0x22   : > { %1460 = vmatprep.subr.bf16.mxu1 %v1569_v42  ;;  %v1576_v49 = vld [vmem:[%s1727_s24 + $0x30] sm:$0xff]   ;;  %v1578_v51 = vld [vmem:[%s1727_s24 + $0x38] sm:$0xff]   ;;  %v545_v55 = vld [vmem:[%s490_s29] sm:$0x3] }
  0x23   : > { %761 = vmatpush1.bf16.msra.mxu0 %v1708_v9  ;;  %v1834_v57 = vrot.slane %v545_v55, %v584_v54  ;;  %v1836_v58 = vrot.slane %v545_v55, %v588_v56 }
  0x24   : > { %762 = vmatprep.subr.bf16.mxu0 %v1712_v10 }
  0x25   : > { %1461 = vmatpush3.bf16.msra.mxu1 %v1570_v43 }
  0x26   : > { %1462 = vmatprep.subr.bf16.mxu1 %v1571_v44 }
  0x27   : > { %763 = vmatpush1.bf16.msra.mxu0 %v1722_v11 }
  0x28   : > { %764 = vmatprep.subr.bf16.mxu0 %v1731_v12 }
  0x29   : > { %1463 = vmatpush3.bf16.msra.mxu1 %v1572_v45 }
  0x2a   : > { %1464 = vmatprep.subr.bf16.mxu1 %v1573_v46 }
  0x2b   : > { %765 = vmatpush1.bf16.msra.mxu0 %v1734_v13 }
  0x2c   : > { %766 = vmatprep.subr.bf16.mxu0 %v1738_v15 }
  0x2d   : > { %1465 = vmatpush3.bf16.msra.mxu1 %v1574_v47 }
  0x2e   : > { %1466 = vmatprep.subr.bf16.mxu1 %v1575_v48 }
  0x2f   : > { %767 = vmatpush1.bf16.msra.mxu0 %v1746_v20 }
  0x30   : > { %768 = vmatprep.subr.bf16.mxu0 %v1749_v21 }
  0x31   : > { %1467 = vmatpush3.bf16.msra.mxu1 %v1576_v49 }
  0x32   : > { %1468 = vmatprep.subr.bf16.mxu1 %v1577_v50 }
  0x33   : > { %769 = vmatpush1.bf16.msra.mxu0 %v1755_v23 }
  0x34   : > { %770 = vmatprep.subr.bf16.mxu0 %v1758_v24 }
  0x35   : > { %1469 = vmatpush3.bf16.msra.mxu1 %v1578_v51 }
  0x36   : > { %951 = vmatprep.subr.bf16.mxu1 %v1673_v0 }
  0x37   : > { %771 = vmatpush1.bf16.msra.mxu0 %v1764_v25 }
  0x38   : > { %772 = vmatprep.subr.bf16.mxu0 %v1768_v26 }
  0x3b   : > { %773 = vmatpush1.bf16.msra.mxu0 %v1772_v27 }
  0x3c   : > { %774 = vmatprep.subr.bf16.mxu0 %v1776_v28 }
  0x3f   : > { %775 = vmatpush1.bf16.msra.mxu0 %v1780_v29 }
  0x40   : > { %776 = vmatprep.subr.bf16.mxu0 %v1784_v30 }
  0x43   : > { %777 = vmatpush1.bf16.msra.mxu0 %v1788_v31 }
  0x44   : > { %778 = vmatprep.subr.bf16.mxu0 %v1792_v32 }
  0x47   : > { %779 = vmatpush1.bf16.msra.mxu0 %v1796_v33 }
  0x48   : > { %780 = vmatprep.subr.bf16.mxu0 %v1800_v34 }
  0x4b   : > { %781 = vmatpush1.bf16.msra.mxu0 %v1804_v35 }
  0x4c   : > { %782 = vmatprep.subr.bf16.mxu0 %v1808_v36 }
  0x4f   : > { %783 = vmatpush1.bf16.msra.mxu0 %v1812_v37 }
  0x50   : > { %1476 = vmatprep.subr.bf16.mxu0 %v1563_v17 }
  0x52   : > { %785 = vmatmul.mubr.bf16.vlgmr.msra.gmra.mrb[0].mxu0 %v579_v39 }
  0x53   : > { %1477 = vmatpush3.bf16.msra.mxu0 %v1564_v18 }
  0x54   : > { %1478 = vmatprep.subr.bf16.mxu0 %v1565_v19 }
  0x57   : > { %1479 = vmatpush3.bf16.msra.mxu0 %v1566_v22 }
  0x58   : > { %1480 = vmatprep.subr.bf16.mxu0 %v1567_v40  ;;  %v511_v40 = vld [vmem:[%s1846_s12 + $0x8] sm:$0xff] }
  0x5b   : > { %1481 = vmatpush3.bf16.msra.mxu0 %v1568_v41 }
  0x5c   : > { %1482 = vmatprep.subr.bf16.mxu0 %v1569_v42 }
  0x5f   : > { %1483 = vmatpush3.bf16.msra.mxu0 %v1570_v43 }
  0x60   : > { %1484 = vmatprep.subr.bf16.mxu0 %v1571_v44  ;;  %v950_v44 = vpack.c.bf16 %v511_v40, %v511_v40 }
  0x63   : > { %1485 = vmatpush3.bf16.msra.mxu0 %v1572_v45 }
  0x64   : > { %1486 = vmatprep.subr.bf16.mxu0 %v1573_v46 }
  0x67   : > { %1487 = vmatpush3.bf16.msra.mxu0 %v1574_v47 }
  0x68   : > { %1488 = vmatprep.subr.bf16.mxu0 %v1575_v48 }
  0x6b   : > { %1489 = vmatpush3.bf16.msra.mxu0 %v1576_v49 }
  0x6c   : > { %1490 = vmatprep.subr.bf16.mxu0 %v1577_v50  ;;  %v1609_v50 = vmov 0.0  }
  0x6f   : > { %1491 = vmatpush3.bf16.msra.mxu0 %v1578_v51  ;;  %v512_v51 = vld [vmem:[%s481_s22] sm:$0xff] }
  0x70   : > { %1500 = vmatprep.subr.mxu0 %v1609_v50  ;;  %1131 = vxpose.xlu1.b32.start.end [1/1] (short) (narrow) %v512_v51, 8 }
 0x125   : > { %v786_v59 = vpop.f32.mrb[0].mxu0 }
 0x126   : > { %v787_v60 = vadd.f32 %v786_v59, %v1834_v57  ;;  %v788_v61 = vpop.f32.mrb[1].mxu0 }
 0x127   : > { %v789_v62 = vadd.f32 %v788_v61, %v1836_v58  ;;  %v790_v63 = vpop.f32.mrb[2].mxu0 }
 0x128   : > { %v795_v0 = vmin.f32 %v787_v60, 0.0  ;;  %v791_v14 = vpop.f32.mrb[3].mxu0  ;;  %vm793_vm0 = vcmp.gt.f32.partialorder %v787_v60, 0.0 }
 0x129   : > { %v796_v16 = vmin.f32 %v789_v62, 0.0  ;;  %vm794_vm1 = vcmp.gt.f32.partialorder %v789_v62, 0.0 }
 0x12a   : > { %v797_v17 = vmul.f32 1.442695, %v795_v0  ;;  %v1147_v0 = vpop.trf.xlu1 }
 0x12b   : > { %v799_v18 = vmul.f32 1.442695, %v796_v16 }
 0x12c   : > { %1579 = vpow2.f32 %v797_v17 }
 0x12d   : > { %1581 = vpow2.f32 %v799_v18 }
 0x136   : > { %v1580_v19 = vpop.eup %1579 }
 0x137   : > { %v1582_v22 = vpop.eup %1581  ;;  %v1426_v38 = vadd.f32 -1.0, %v1580_v19 }
 0x138   : > { %v1427_v39 = vadd.f32 -1.0, %v1582_v22 }
 0x139   : > { %v803_v41 = vsel %vm793_vm0, %v787_v60, %v1426_v38 }
 0x13a   : > { %v804_v42 = vsel %vm794_vm1, %v789_v62, %v1427_v39  ;;  %v805_v45 = vpack.c.bf16 %v803_v41, %v803_v41 }
 0x13b   : > { %v806_v43 = vpack.c.bf16 %v804_v42, %v804_v42 }
 0x13d   : > { %941 = vmatprep.mubr.bf16.mxu1 %v806_v43 }
 0x13e   : > { %942 = vmatmul.mubr.bf16.vlgmr.msra.gmra.mrb[0].mxu1 %v805_v45 }
 0x13f   : > { %952 = vmatpush1.bf16.msra.mxu1 %v1676_v1  ;;  %983 = vmatprep.mubr.bf16.mxu1 %v950_v44  ;;  %v510_v1 = vld [vmem:[%s1846_s12] sm:$0xff] }
 0x140   : > { %953 = vmatprep.subr.bf16.mxu1 %v1680_v2  ;;  %v949_v2 = vpack.c.bf16 %v510_v1, %v510_v1 }
 0x143   : > { %954 = vmatpush1.bf16.msra.mxu1 %v1684_v3 }
 0x144   : > { %955 = vmatprep.subr.bf16.mxu1 %v1688_v4  ;;  %v1428_v4 = vld [vmem:[%s498_s15] ss:$0 sm:$0xff] }
 0x147   : > { %956 = vmatpush1.bf16.msra.mxu1 %v1692_v5 }
 0x148   : > { %957 = vmatprep.subr.bf16.mxu1 %v1696_v6 }
 0x14b   : > { %958 = vmatpush1.bf16.msra.mxu1 %v1700_v7 }
 0x14c   : > { %959 = vmatprep.subr.bf16.mxu1 %v1704_v8 }
 0x14f   : > { %960 = vmatpush1.bf16.msra.mxu1 %v1708_v9 }
 0x150   : > { %961 = vmatprep.subr.bf16.mxu1 %v1712_v10 }
 0x153   : > { %962 = vmatpush1.bf16.msra.mxu1 %v1722_v11 }
 0x154   : > { %963 = vmatprep.subr.bf16.mxu1 %v1731_v12 }
 0x157   : > { %964 = vmatpush1.bf16.msra.mxu1 %v1734_v13 }
 0x158   : > { %965 = vmatprep.subr.bf16.mxu1 %v1738_v15 }
 0x15b   : > { %966 = vmatpush1.bf16.msra.mxu1 %v1746_v20 }
 0x15c   : > { %967 = vmatprep.subr.bf16.mxu1 %v1749_v21 }
 0x15f   : > { %968 = vmatpush1.bf16.msra.mxu1 %v1755_v23 }
 0x160   : > { %969 = vmatprep.subr.bf16.mxu1 %v1758_v24 }
 0x163   : > { %970 = vmatpush1.bf16.msra.mxu1 %v1764_v25 }
 0x164   : > { %971 = vmatprep.subr.bf16.mxu1 %v1768_v26 }
 0x167   : > { %972 = vmatpush1.bf16.msra.mxu1 %v1772_v27 }
 0x168   : > { %973 = vmatprep.subr.bf16.mxu1 %v1776_v28 }
 0x16b   : > { %974 = vmatpush1.bf16.msra.mxu1 %v1780_v29 }
 0x16c   : > { %975 = vmatprep.subr.bf16.mxu1 %v1784_v30 }
 0x16f   : > { %976 = vmatpush1.bf16.msra.mxu1 %v1788_v31 }
 0x170   : > { %977 = vmatprep.subr.bf16.mxu1 %v1792_v32 }
 0x173   : > { %978 = vmatpush1.bf16.msra.mxu1 %v1796_v33 }
 0x174   : > { %979 = vmatprep.subr.bf16.mxu1 %v1800_v34 }
 0x177   : > { %980 = vmatpush1.bf16.msra.mxu1 %v1804_v35 }
 0x178   : > { %981 = vmatprep.subr.bf16.mxu1 %v1808_v36 }
 0x17b   : > { %982 = vmatpush1.bf16.msra.mxu1 %v1812_v37 }
 0x17e   : > { %984 = vmatmul.mubr.bf16.vlgmr.msra.gmra.mrb[4].mxu1 %v949_v2 }
 0x211   : > { %v1470_v3 = vpop.f32.mrb[0].mxu1 }
 0x212   : > { %v1471_v5 = vpop.f32.mrb[1].mxu1 }
 0x213   : > { %v1472_v6 = vadd.f32 %v1471_v5, %v1470_v3  ;;  %v1473_v7 = vpop.f32.mrb[2].mxu1 }
 0x214   : > { %v1474_v8 = vpop.f32.mrb[3].mxu1 }
 0x215   : > { %v944_v9 = vadd.f32 %v1472_v6, %v1428_v4 }
 0x217   : > { %1217 = vst [vmem:[%s1890_s18] sm:$0xff] %v944_v9  ;;  %v1046_v49 = vmul.f32 %v944_v9, %v944_v9 }
 0x251   : > { %v985_v10 = vpop.f32.mrb[4].mxu1 }
 0x252   : > { %v986_v11 = vadd.f32 %v985_v10, %v1834_v57  ;;  %v987_v12 = vpop.f32.mrb[5].mxu1 }
 0x253   : > { %v988_v13 = vadd.f32 %v987_v12, %v1836_v58  ;;  %v989_v15 = vpop.f32.mrb[6].mxu1 }
 0x254   : > { %v994_v20 = vmin.f32 %v986_v11, 0.0  ;;  %v990_v21 = vpop.f32.mrb[7].mxu1  ;;  %vm992_vm2 = vcmp.gt.f32.partialorder %v986_v11, 0.0 }
 0x255   : > { %v995_v23 = vmin.f32 %v988_v13, 0.0  ;;  %vm993_vm3 = vcmp.gt.f32.partialorder %v988_v13, 0.0 }
 0x256   : > { %v996_v24 = vmul.f32 1.442695, %v994_v20 }
 0x257   : > { %v998_v25 = vmul.f32 1.442695, %v995_v23 }
 0x258   : > { %1583 = vpow2.f32 %v996_v24 }
 0x259   : > { %1585 = vpow2.f32 %v998_v25 }
 0x262   : > { %v1584_v26 = vpop.eup %1583 }
 0x263   : > { %v1586_v27 = vpop.eup %1585  ;;  %v1445_v28 = vadd.f32 -1.0, %v1584_v26 }
 0x264   : > { %v1446_v29 = vadd.f32 -1.0, %v1586_v27 }
 0x265   : > { %v1002_v30 = vsel %vm992_vm2, %v986_v11, %v1445_v28 }
 0x266   : > { %v1003_v31 = vsel %vm993_vm3, %v988_v13, %v1446_v29  ;;  %v1004_v33 = vpack.c.bf16 %v1002_v30, %v1002_v30 }
 0x267   : > { %v1005_v32 = vpack.c.bf16 %v1003_v31, %v1003_v31 }
 0x269   : > { %1038 = vmatprep.mubr.bf16.mxu0 %v1005_v32 }
 0x26a   : > { %1039 = vmatmul.mubr.bf16.vlgmr.msra.gmra.mrb[4].mxu0 %v1004_v33 }
 0x26b   : > { %1502 = vmatprep.mubr.msk.f32.mxu0 %vm1610_vm4, %v1609_v50 }
 0x33d   : > { %v1492_v34 = vpop.f32.mrb[4].mxu0 }
 0x33e   : > { %v1493_v35 = vpop.f32.mrb[5].mxu0 }
 0x33f   : > { %v1494_v36 = vadd.f32 %v1493_v35, %v1492_v34  ;;  %v1495_v37 = vpop.f32.mrb[6].mxu0 }
 0x340   : > { %v1496_v46 = vpop.f32.mrb[7].mxu0 }
 0x341   : > { %v1041_v47 = vadd.f32 %v1494_v36, %v1428_v4 }
 0x343   : > { %1218 = vst [vmem:[%s1890_s18 + $0x8] sm:$0xff] %v1041_v47  ;;  %v1053_v48 = vmul.f32 %v1041_v47, %v1041_v47 }
 0x345   : > { %1054 = vadd.xlane.f32.xlu0 %v1053_v48 }
 0x349   : > { %1047 = vadd.xlane.f32.xlu0 %v1046_v49 }
 0x3d2   : > { %v1055_v52 = vpop.xlane.xlu0 %1054 }
 0x3d3   : > { %v1056_v53 = vadd.f32 1e-12, %v1055_v52 }
 0x3d5   : > { %1587 = vrsqrt.f32 %v1056_v53 }
 0x3d6   : > { %v1048_v54 = vpop.xlane.xlu0 %1047 }
 0x3d7   : > { %v1049_v55 = vadd.f32 1e-12, %v1048_v54 }
 0x3d9   : > { %1589 = vrsqrt.f32 %v1049_v55 }
 0x3df   : > { %v1588_v56 = vpop.eup %1587 }
 0x3e0   : > { %v1058_v57 = vmul.f32 %v1588_v56, %v1041_v47 }
 0x3e2   : > { %1501 = vmatpush3.xpose.msra.mxu0 %v1058_v57 }
 0x3e3   : > { %v1590_v58 = vpop.eup %1589 }
 0x3e4   : > { %v1051_v59 = vmul.f32 2.0, %v1590_v58 }
 0x3e6   : > { %v1052_v60 = vmul.f32 %v1051_v59, %v944_v9 }
 0x3e8   : > { %1503 = vmatmul.mubr.f32.vlgmr.msra.gmra.mrb[8].mxu0 %v1052_v60 }
 0x4bb   : > { %v1125_v61 = vpop.f32.mrb[8].mxu0 }
 0x4bc   : > { %v1129_v62 = vmul.f32 1.442695, %v1125_v61  ;;  %v1504_v63 = vpop.f32.mrb[9].mxu0 }
 0x4be   : > { %1591 = vpow2.f32 %v1129_v62 }
 0x4c8   : > { %v1592_v14 = vpop.eup %1591 }
 0x4c9   : > { %v1180_v16 = vmul.f32 %v1592_v14, %v1147_v0  ;;  %v1164_v17 = vsel %vm1163_vm5, %v1592_v14, 0.0  ;;  %v1168_v18 = vmul.f32 %v1592_v14, %v512_v51 }
 0x4ca   : > { %1165 = vadd.xlane.f32.xlu1 %v1164_v17  ;;  %v1173_v19 = vrot.slane %v1164_v17, 4 }
 0x4cb   : > { %v1181_v22 = vsel %vm1163_vm5, %v1180_v16, 0.0  ;;  %v1169_v38 = vsel %vm1163_vm5, %v1168_v18, 0.0 }
 0x4cc   : > { %v1182_v39 = vrot.slane %v1181_v22, 4  ;;  %v1174_v40 = vadd.f32 %v1173_v19, %v1164_v17  ;;  %1170 = vadd.xlane.f32.xlu0 %v1169_v38 }
 0x4ce   : > { %v1183_v41 = vadd.f32 %v1182_v39, %v1181_v22  ;;  %v1175_v42 = vrot.slane %v1174_v40, 2 }
 0x4d0   : > { %v1184_v43 = vrot.slane %v1183_v41, 2  ;;  %v1176_v44 = vadd.f32 %v1175_v42, %v1174_v40 }
 0x4d2   : > { %v1185_v45 = vadd.f32 %v1184_v43, %v1183_v41  ;;  %v1177_v1 = vrot.slane %v1176_v44, 1 }
 0x4d4   : > { %v1186_v2 = vrot.slane %v1185_v45, 1  ;;  %v1178_v3 = vadd.f32 %v1177_v1, %v1176_v44 }
 0x4d6   : > { %v1187_v4 = vadd.f32 %v1186_v2, %v1185_v45  ;;  %v1179_v5 = vadd.f32 1e-08, %v1178_v3 }
 0x4d8   : > { %v1188_v6 = vadd.f32 1e-12, %v1187_v4  ;;  %1593 = vlog2.f32 %v1179_v5 }
 0x4da   : > { %1595 = vlog2.f32 %v1188_v6 }
 0x4e2   : > { %v1594_v7 = vpop.eup %1593 }
 0x4e3   : > { %v1206_v10 = vmul.f32 0.6931472, %v1594_v7 }
 0x4e4   : > { %v1596_v8 = vpop.eup %1595 }
 0x4e5   : > { %v1204_v9 = vmul.f32 0.6931472, %v1596_v8 }
 0x4e7   : > { %v1207_v11 = vsub.f32 %v1204_v9, %v1206_v10 }
 0x4e9   : > { %v1208_v12 = vsel %vm1163_vm5, %v1207_v11, 0.0 }
 0x4ea   : > { %1209 = vadd.xlane.f32.xlu0 %v1208_v12 }
 0x557   : > { %v1166_v13 = vpop.xlane.xlu1 %1165 }
 0x558   : > { %v1167_v15 = vadd.f32 1e-08, %v1166_v13 }
 0x559   : > { %v1171_v20 = vpop.xlane.xlu0 %1170 }
 0x55a   : > { %1597 = vlog2.f32 %v1167_v15  ;;  %v1172_v21 = vadd.f32 1e-12, %v1171_v20 }
 0x55c   : > { %1599 = vlog2.f32 %v1172_v21 }
 0x564   : > { %v1598_v23 = vpop.eup %1597 }
 0x565   : > { %v1192_v25 = vmul.f32 0.6931472, %v1598_v23 }
 0x566   : > { %v1600_v24 = vpop.eup %1599 }
 0x567   : > { %v1190_v26 = vmul.f32 0.6931472, %v1600_v24 }
 0x569   : > { %v1193_v27 = vsub.f32 %v1190_v26, %v1192_v25 }
 0x56b   : > { %v1194_v28 = vrot.slane %v1193_v27, 4 }
 0x56d   : > { %v1195_v29 = vadd.f32 %v1194_v28, %v1193_v27 }
 0x56f   : > { %v1196_v30 = vrot.slane %v1195_v29, 2 }
 0x571   : > { %v1197_v31 = vadd.f32 %v1196_v30, %v1195_v29 }
 0x573   : > { %v1198_v32 = vrot.slane %v1197_v31, 1 }
 0x575   : > { %v1199_v33 = vadd.f32 %v1198_v32, %v1197_v31 }
 0x577   : > { %v1201_v34 = vmul.f32 0.125, %v1199_v33  ;;  %v1210_v35 = vpop.xlane.xlu0 %1209 }
 0x578   : > { %v1211_v36 = vmul.f32 0.125, %v1210_v35 }
 0x579   : > { %v1202_v37 = vsub.f32 0.0, %v1201_v34 }
 0x57a   : > { %v1212_v46 = vsub.f32 0.0, %v1211_v36 }
 0x57b   : > { %v1213_v47 = vmul.f32 0.5, %v1202_v37 }
 0x57c   : > { %v1214_v48 = vmul.f32 0.5, %v1212_v46 }
 0x57e   : > { %v1215_v49 = vadd.f32 %v1214_v48, %v1213_v47 }
 0x580   : > { %1216 = vst [vmem:[%s501_s25] sm:$0x1] %v1215_v49 }
 0x581 PF: > { %s19_s27 = sadd.s32 1, %s1607_s27  }
 0x582   : > { %p16_p7 = scmp.ge.s32.totalorder %s19_s27, 6  }
 0x584   :  { %18 = sbr.rel (!%p16_p7) target bundleno = 1 (0x1), region = 108 }

</bundles_post_ra>
